<compile_context>
chip_gen: v7x
topology: tpu7x:2x2x1
jax: 0.10.0
libtpu: 0.0.40
codegen_flags: <defaults>
</compile_context>

<pallas_src>
import jax
import jax.numpy as jnp
from jax.experimental import pallas as pl
from jax.experimental.pallas import tpu as pltpu


def residual_up_kernel(x_ref, w_ref, b_ref, e_ref, d_ref, out_ref):
    """One batch element per grid step.

    x_ref:   (Cin*H, W)    NCHW image, channels stacked along sublanes.
    w_ref:   (Cout, Cin)   1x1 conv weight.
    b_ref:   (1, Cout)     conv bias.
    e_ref:   (2H, H)       0/1 row-duplication matrix  E[r, h] = (r // 2 == h).
    d_ref:   (W, 2W)       0/1 col-duplication matrix  D[w, q] = (q // 2 == w).
    out_ref: (Cout*2H, 2W) upsampled NCHW output, channels stacked along sublanes.
    """
    Cout, Cin = w_ref.shape
    CinH, W = x_ref.shape
    H = CinH // Cin
    H2 = 2 * H

    x = x_ref[...]          # (Cin*H, W)
    w = w_ref[...]          # (Cout, Cin)
    b = b_ref[...]          # (1, Cout)
    E = e_ref[...]          # (2H, H)
    D = d_ref[...]          # (W, 2W)

    for c in range(Cout):
        # Pointwise (1x1) conv for output channel c at low resolution: exact f32 VPU MACs.
        acc = w[c:c + 1, 0:1] * x[0:H, :]
        for ci in range(1, Cin):
            acc = acc + w[c:c + 1, ci:ci + 1] * x[ci * H:(ci + 1) * H, :]
        acc = acc + b[0:1, c:c + 1]                                    # (H, W)

        # Nearest 2x upsample: row-duplicate (E @ .) and column-duplicate (. @ D).
        # Each output element selects exactly one acc element, so adding the bias
        # before the duplication is exact.
        cols = jnp.dot(acc, D, preferred_element_type=jnp.float32)    # (H, 2W)
        up = jnp.dot(E, cols, preferred_element_type=jnp.float32)     # (2H, 2W)

        out_ref[c * H2:(c + 1) * H2, :] = up


def residual_up(x_nchw, w, b):
    """x_nchw: (N, Cin, H, W) f32; w: (Cout, Cin); b: (Cout,) -> (N, Cout, 2H, 2W) f32."""
    N, Cin, H, W = x_nchw.shape
    Cout = w.shape[0]
    H2, W2 = 2 * H, 2 * W

    x_k = x_nchw.reshape(N, Cin * H, W)          # free contiguous view (no transpose)
    b_k = b.reshape(1, Cout)

    # 0/1 duplication matrices for the nearest-neighbour 2x upsample (built once in XLA).
    E = (jnp.arange(H2)[:, None] // 2 == jnp.arange(H)[None, :]).astype(jnp.float32)
    D = (jnp.arange(W)[:, None] == jnp.arange(W2)[None, :] // 2).astype(jnp.float32)

    flops = N * Cout * (2 * Cin * H * W          # 1x1 conv MACs (low resolution)
                        + 2 * H * W * W2         # acc @ D
                        + 2 * H2 * H * W2)       # E @ (acc @ D)
    bytes_accessed = 4 * (x_k.size + N * Cout * H2 * W2
                          + N * (w.size + b_k.size + E.size + D.size))

    out = pl.pallas_call(
        residual_up_kernel,
        out_shape=jax.ShapeDtypeStruct((N, Cout * H2, W2), jnp.float32),
        grid_spec=pltpu.PrefetchScalarGridSpec(
            num_scalar_prefetch=0,
            grid=(N,),
            in_specs=[
                pl.BlockSpec((None, Cin * H, W), lambda n: (n, 0, 0)),   # x, batch squeezed
                pl.BlockSpec((Cout, Cin), lambda n: (0, 0)),             # w
                pl.BlockSpec((1, Cout), lambda n: (0, 0)),               # b
                pl.BlockSpec((H2, H), lambda n: (0, 0)),                 # E
                pl.BlockSpec((W, W2), lambda n: (0, 0)),                 # D
            ],
            out_specs=pl.BlockSpec((None, Cout * H2, W2), lambda n: (n, 0, 0)),
        ),
        compiler_params=pltpu.CompilerParams(dimension_semantics=("parallel",)),
        cost_estimate=pl.CostEstimate(flops=flops, transcendentals=0,
                                      bytes_accessed=bytes_accessed),
    )(x_k, w, b_k, E, D)

    return out.reshape(N, Cout, H2, W2)          # free contiguous view back to NCHW


def reference_forward(x_nchw, w, b):
    """Pure-JAX reference mirroring the PyTorch module exactly:
    nearest 2x upsample, then 1x1 conv (elementwise formulation, exact f32)."""
    up = jnp.repeat(jnp.repeat(x_nchw, 2, axis=2), 2, axis=3)        # (N, Cin, 2H, 2W)
    y = jnp.sum(w[None, :, :, None, None] * up[:, None, :, :, :], axis=2)
    return y + b[None, :, None, None]


if __name__ == "__main__":
    key = jax.random.PRNGKey(0)
    k_x, k_w, k_b = jax.random.split(key, 3)

    N, Cin, H, W = 2, 4, 16, 16
    Cout = 8

    x = jax.random.normal(k_x, (N, Cin, H, W), jnp.float32)
    w = 0.1 * jax.random.normal(k_w, (Cout, Cin), jnp.float32)
    b = 0.1 * jax.random.normal(k_b, (Cout,), jnp.float32)

    out = jax.block_until_ready(residual_up(x, w, b))
    ref = jax.block_until_ready(reference_forward(x, w, b))

    assert out.shape == (N, Cout, 2 * H, 2 * W), out.shape
    max_err = float(jnp.max(jnp.abs(out - ref)))
    assert jnp.allclose(out, ref, atol=1e-4, rtol=1e-4), max_err

    print("KERNEL_OK")
</pallas_src>

<mosaic_0001>
module attributes {stable_mosaic.version = 11 : i64} {
  func.func @residual_up_kernel(%arg0: i32, %arg1: memref<1x64x16xf32, #tpu.memory_space<vmem>>, %arg2: memref<8x4xf32, #tpu.memory_space<vmem>>, %arg3: memref<1x8xf32, #tpu.memory_space<vmem>>, %arg4: memref<32x16xf32, #tpu.memory_space<vmem>>, %arg5: memref<16x32xf32, #tpu.memory_space<vmem>>, %arg6: memref<1x256x32xf32, #tpu.memory_space<vmem>>) attributes {dimension_semantics = [#tpu.dimension_semantics<parallel>], iteration_bounds = array<i64: 2>, scalar_prefetch = 0 : i64, scratch_operands = 0 : i64, tpu.core_type = #tpu.core_type<tc>, window_params = [{transform_indices = @transform_0, window_bounds = array<i64: 1, 64, 16>}, {pipeline_mode = #tpu.pipeline_mode<synchronous>, transform_indices = @transform_1, window_bounds = array<i64: 8, 4>}, {pipeline_mode = #tpu.pipeline_mode<synchronous>, transform_indices = @transform_2, window_bounds = array<i64: 1, 8>}, {pipeline_mode = #tpu.pipeline_mode<synchronous>, transform_indices = @transform_3, window_bounds = array<i64: 32, 16>}, {pipeline_mode = #tpu.pipeline_mode<synchronous>, transform_indices = @transform_4, window_bounds = array<i64: 16, 32>}, {transform_indices = @transform_5, window_bounds = array<i64: 1, 256, 32>}]} {
    %c0 = arith.constant 0 : index
    %c0_0 = arith.constant 0 : index
    %c0_1 = arith.constant 0 : index
    %0 = vector.load %arg1[%c0, %c0_0, %c0_1] : memref<1x64x16xf32, #tpu.memory_space<vmem>>, vector<1x64x16xf32>
    %1 = vector.shape_cast %0 : vector<1x64x16xf32> to vector<64x16xf32>
    %c0_2 = arith.constant 0 : index
    %c0_3 = arith.constant 0 : index
    %2 = vector.load %arg2[%c0_2, %c0_3] : memref<8x4xf32, #tpu.memory_space<vmem>>, vector<8x4xf32>
    %c0_4 = arith.constant 0 : index
    %c0_5 = arith.constant 0 : index
    %3 = vector.load %arg3[%c0_4, %c0_5] : memref<1x8xf32, #tpu.memory_space<vmem>>, vector<1x8xf32>
    %c0_6 = arith.constant 0 : index
    %c0_7 = arith.constant 0 : index
    %4 = vector.load %arg4[%c0_6, %c0_7] : memref<32x16xf32, #tpu.memory_space<vmem>>, vector<32x16xf32>
    %c0_8 = arith.constant 0 : index
    %c0_9 = arith.constant 0 : index
    %5 = vector.load %arg5[%c0_8, %c0_9] : memref<16x32xf32, #tpu.memory_space<vmem>>, vector<16x32xf32>
    %6 = vector.extract_strided_slice %2 {offsets = [0, 0], sizes = [1, 1], strides = [1, 1]} : vector<8x4xf32> to vector<1x1xf32>
    %7 = vector.extract_strided_slice %1 {offsets = [0, 0], sizes = [16, 16], strides = [1, 1]} : vector<64x16xf32> to vector<16x16xf32>
    %8 = vector.broadcast %6 : vector<1x1xf32> to vector<16x16xf32>
    %9 = arith.mulf %8, %7 : vector<16x16xf32>
    %10 = vector.extract_strided_slice %2 {offsets = [0, 1], sizes = [1, 1], strides = [1, 1]} : vector<8x4xf32> to vector<1x1xf32>
    %11 = vector.extract_strided_slice %1 {offsets = [16, 0], sizes = [16, 16], strides = [1, 1]} : vector<64x16xf32> to vector<16x16xf32>
    %12 = vector.broadcast %10 : vector<1x1xf32> to vector<16x16xf32>
    %13 = arith.mulf %12, %11 : vector<16x16xf32>
    %14 = arith.addf %9, %13 : vector<16x16xf32>
    %15 = vector.extract_strided_slice %2 {offsets = [0, 2], sizes = [1, 1], strides = [1, 1]} : vector<8x4xf32> to vector<1x1xf32>
    %16 = vector.extract_strided_slice %1 {offsets = [32, 0], sizes = [16, 16], strides = [1, 1]} : vector<64x16xf32> to vector<16x16xf32>
    %17 = vector.broadcast %15 : vector<1x1xf32> to vector<16x16xf32>
    %18 = arith.mulf %17, %16 : vector<16x16xf32>
    %19 = arith.addf %14, %18 : vector<16x16xf32>
    %20 = vector.extract_strided_slice %2 {offsets = [0, 3], sizes = [1, 1], strides = [1, 1]} : vector<8x4xf32> to vector<1x1xf32>
    %21 = vector.extract_strided_slice %1 {offsets = [48, 0], sizes = [16, 16], strides = [1, 1]} : vector<64x16xf32> to vector<16x16xf32>
    %22 = vector.broadcast %20 : vector<1x1xf32> to vector<16x16xf32>
    %23 = arith.mulf %22, %21 : vector<16x16xf32>
    %24 = arith.addf %19, %23 : vector<16x16xf32>
    %25 = vector.extract_strided_slice %3 {offsets = [0, 0], sizes = [1, 1], strides = [1, 1]} : vector<1x8xf32> to vector<1x1xf32>
    %26 = vector.broadcast %25 : vector<1x1xf32> to vector<16x16xf32>
    %27 = arith.addf %24, %26 : vector<16x16xf32>
    %cst = arith.constant dense<0.000000e+00> : vector<16x32xf32>
    %28 = tpu.matmul %27, %5, %cst {dimension_numbers = #tpu.dot_dimension_numbers<[1], [0], [0], [1], [0, 0, 1, 1], [], []>} : vector<16x16xf32>, vector<16x32xf32>, vector<16x32xf32> -> vector<16x32xf32>
    %cst_10 = arith.constant dense<0.000000e+00> : vector<32x32xf32>
    %29 = tpu.matmul %4, %28, %cst_10 {dimension_numbers = #tpu.dot_dimension_numbers<[1], [0], [0], [1], [0, 0, 1, 1], [], []>} : vector<32x16xf32>, vector<16x32xf32>, vector<32x32xf32> -> vector<32x32xf32>
    %c0_11 = arith.constant 0 : index
    %c0_12 = arith.constant 0 : index
    %c0_13 = arith.constant 0 : index
    %30 = vector.load %arg6[%c0_11, %c0_12, %c0_13] : memref<1x256x32xf32, #tpu.memory_space<vmem>>, vector<1x32x32xf32>
    %31 = vector.shape_cast %30 : vector<1x32x32xf32> to vector<32x32xf32>
    %32 = vector.shape_cast %29 : vector<32x32xf32> to vector<1x32x32xf32>
    tpu.vector_store %arg6[%c0_11, %c0_12, %c0_13], %32 {strides = array<i32>} : memref<1x256x32xf32, #tpu.memory_space<vmem>>, vector<1x32x32xf32>,
    %33 = vector.extract_strided_slice %2 {offsets = [1, 0], sizes = [1, 1], strides = [1, 1]} : vector<8x4xf32> to vector<1x1xf32>
    %34 = vector.extract_strided_slice %1 {offsets = [0, 0], sizes = [16, 16], strides = [1, 1]} : vector<64x16xf32> to vector<16x16xf32>
    %35 = vector.broadcast %33 : vector<1x1xf32> to vector<16x16xf32>
    %36 = arith.mulf %35, %34 : vector<16x16xf32>
    %37 = vector.extract_strided_slice %2 {offsets = [1, 1], sizes = [1, 1], strides = [1, 1]} : vector<8x4xf32> to vector<1x1xf32>
    %38 = vector.extract_strided_slice %1 {offsets = [16, 0], sizes = [16, 16], strides = [1, 1]} : vector<64x16xf32> to vector<16x16xf32>
    %39 = vector.broadcast %37 : vector<1x1xf32> to vector<16x16xf32>
    %40 = arith.mulf %39, %38 : vector<16x16xf32>
    %41 = arith.addf %36, %40 : vector<16x16xf32>
    %42 = vector.extract_strided_slice %2 {offsets = [1, 2], sizes = [1, 1], strides = [1, 1]} : vector<8x4xf32> to vector<1x1xf32>
    %43 = vector.extract_strided_slice %1 {offsets = [32, 0], sizes = [16, 16], strides = [1, 1]} : vector<64x16xf32> to vector<16x16xf32>
    %44 = vector.broadcast %42 : vector<1x1xf32> to vector<16x16xf32>
    %45 = arith.mulf %44, %43 : vector<16x16xf32>
    %46 = arith.addf %41, %45 : vector<16x16xf32>
    %47 = vector.extract_strided_slice %2 {offsets = [1, 3], sizes = [1, 1], strides = [1, 1]} : vector<8x4xf32> to vector<1x1xf32>
    %48 = vector.extract_strided_slice %1 {offsets = [48, 0], sizes = [16, 16], strides = [1, 1]} : vector<64x16xf32> to vector<16x16xf32>
    %49 = vector.broadcast %47 : vector<1x1xf32> to vector<16x16xf32>
    %50 = arith.mulf %49, %48 : vector<16x16xf32>
    %51 = arith.addf %46, %50 : vector<16x16xf32>
    %52 = vector.extract_strided_slice %3 {offsets = [0, 1], sizes = [1, 1], strides = [1, 1]} : vector<1x8xf32> to vector<1x1xf32>
    %53 = vector.broadcast %52 : vector<1x1xf32> to vector<16x16xf32>
    %54 = arith.addf %51, %53 : vector<16x16xf32>
    %cst_14 = arith.constant dense<0.000000e+00> : vector<16x32xf32>
    %55 = tpu.matmul %54, %5, %cst_14 {dimension_numbers = #tpu.dot_dimension_numbers<[1], [0], [0], [1], [0, 0, 1, 1], [], []>} : vector<16x16xf32>, vector<16x32xf32>, vector<16x32xf32> -> vector<16x32xf32>
    %cst_15 = arith.constant dense<0.000000e+00> : vector<32x32xf32>
    %56 = tpu.matmul %4, %55, %cst_15 {dimension_numbers = #tpu.dot_dimension_numbers<[1], [0], [0], [1], [0, 0, 1, 1], [], []>} : vector<32x16xf32>, vector<16x32xf32>, vector<32x32xf32> -> vector<32x32xf32>
    %c0_16 = arith.constant 0 : index
    %c32 = arith.constant 32 : index
    %c0_17 = arith.constant 0 : index
    %57 = vector.load %arg6[%c0_16, %c32, %c0_17] : memref<1x256x32xf32, #tpu.memory_space<vmem>>, vector<1x32x32xf32>
    %58 = vector.shape_cast %57 : vector<1x32x32xf32> to vector<32x32xf32>
    %59 = vector.shape_cast %56 : vector<32x32xf32> to vector<1x32x32xf32>
    tpu.vector_store %arg6[%c0_16, %c32, %c0_17], %59 {strides = array<i32>} : memref<1x256x32xf32, #tpu.memory_space<vmem>>, vector<1x32x32xf32>,
    %60 = vector.extract_strided_slice %2 {offsets = [2, 0], sizes = [1, 1], strides = [1, 1]} : vector<8x4xf32> to vector<1x1xf32>
    %61 = vector.extract_strided_slice %1 {offsets = [0, 0], sizes = [16, 16], strides = [1, 1]} : vector<64x16xf32> to vector<16x16xf32>
    %62 = vector.broadcast %60 : vector<1x1xf32> to vector<16x16xf32>
    %63 = arith.mulf %62, %61 : vector<16x16xf32>
    %64 = vector.extract_strided_slice %2 {offsets = [2, 1], sizes = [1, 1], strides = [1, 1]} : vector<8x4xf32> to vector<1x1xf32>
    %65 = vector.extract_strided_slice %1 {offsets = [16, 0], sizes = [16, 16], strides = [1, 1]} : vector<64x16xf32> to vector<16x16xf32>
    %66 = vector.broadcast %64 : vector<1x1xf32> to vector<16x16xf32>
    %67 = arith.mulf %66, %65 : vector<16x16xf32>
    %68 = arith.addf %63, %67 : vector<16x16xf32>
    %69 = vector.extract_strided_slice %2 {offsets = [2, 2], sizes = [1, 1], strides = [1, 1]} : vector<8x4xf32> to vector<1x1xf32>
    %70 = vector.extract_strided_slice %1 {offsets = [32, 0], sizes = [16, 16], strides = [1, 1]} : vector<64x16xf32> to vector<16x16xf32>
    %71 = vector.broadcast %69 : vector<1x1xf32> to vector<16x16xf32>
    %72 = arith.mulf %71, %70 : vector<16x16xf32>
    %73 = arith.addf %68, %72 : vector<16x16xf32>
    %74 = vector.extract_strided_slice %2 {offsets = [2, 3], sizes = [1, 1], strides = [1, 1]} : vector<8x4xf32> to vector<1x1xf32>
    %75 = vector.extract_strided_slice %1 {offsets = [48, 0], sizes = [16, 16], strides = [1, 1]} : vector<64x16xf32> to vector<16x16xf32>
    %76 = vector.broadcast %74 : vector<1x1xf32> to vector<16x16xf32>
    %77 = arith.mulf %76, %75 : vector<16x16xf32>
    %78 = arith.addf %73, %77 : vector<16x16xf32>
    %79 = vector.extract_strided_slice %3 {offsets = [0, 2], sizes = [1, 1], strides = [1, 1]} : vector<1x8xf32> to vector<1x1xf32>
    %80 = vector.broadcast %79 : vector<1x1xf32> to vector<16x16xf32>
    %81 = arith.addf %78, %80 : vector<16x16xf32>
    %cst_18 = arith.constant dense<0.000000e+00> : vector<16x32xf32>
    %82 = tpu.matmul %81, %5, %cst_18 {dimension_numbers = #tpu.dot_dimension_numbers<[1], [0], [0], [1], [0, 0, 1, 1], [], []>} : vector<16x16xf32>, vector<16x32xf32>, vector<16x32xf32> -> vector<16x32xf32>
    %cst_19 = arith.constant dense<0.000000e+00> : vector<32x32xf32>
    %83 = tpu.matmul %4, %82, %cst_19 {dimension_numbers = #tpu.dot_dimension_numbers<[1], [0], [0], [1], [0, 0, 1, 1], [], []>} : vector<32x16xf32>, vector<16x32xf32>, vector<32x32xf32> -> vector<32x32xf32>
    %c0_20 = arith.constant 0 : index
    %c64 = arith.constant 64 : index
    %c0_21 = arith.constant 0 : index
    %84 = vector.load %arg6[%c0_20, %c64, %c0_21] : memref<1x256x32xf32, #tpu.memory_space<vmem>>, vector<1x32x32xf32>
    %85 = vector.shape_cast %84 : vector<1x32x32xf32> to vector<32x32xf32>
    %86 = vector.shape_cast %83 : vector<32x32xf32> to vector<1x32x32xf32>
    tpu.vector_store %arg6[%c0_20, %c64, %c0_21], %86 {strides = array<i32>} : memref<1x256x32xf32, #tpu.memory_space<vmem>>, vector<1x32x32xf32>,
    %87 = vector.extract_strided_slice %2 {offsets = [3, 0], sizes = [1, 1], strides = [1, 1]} : vector<8x4xf32> to vector<1x1xf32>
    %88 = vector.extract_strided_slice %1 {offsets = [0, 0], sizes = [16, 16], strides = [1, 1]} : vector<64x16xf32> to vector<16x16xf32>
    %89 = vector.broadcast %87 : vector<1x1xf32> to vector<16x16xf32>
    %90 = arith.mulf %89, %88 : vector<16x16xf32>
    %91 = vector.extract_strided_slice %2 {offsets = [3, 1], sizes = [1, 1], strides = [1, 1]} : vector<8x4xf32> to vector<1x1xf32>
    %92 = vector.extract_strided_slice %1 {offsets = [16, 0], sizes = [16, 16], strides = [1, 1]} : vector<64x16xf32> to vector<16x16xf32>
    %93 = vector.broadcast %91 : vector<1x1xf32> to vector<16x16xf32>
    %94 = arith.mulf %93, %92 : vector<16x16xf32>
    %95 = arith.addf %90, %94 : vector<16x16xf32>
    %96 = vector.extract_strided_slice %2 {offsets = [3, 2], sizes = [1, 1], strides = [1, 1]} : vector<8x4xf32> to vector<1x1xf32>
    %97 = vector.extract_strided_slice %1 {offsets = [32, 0], sizes = [16, 16], strides = [1, 1]} : vector<64x16xf32> to vector<16x16xf32>
    %98 = vector.broadcast %96 : vector<1x1xf32> to vector<16x16xf32>
    %99 = arith.mulf %98, %97 : vector<16x16xf32>
    %100 = arith.addf %95, %99 : vector<16x16xf32>
    %101 = vector.extract_strided_slice %2 {offsets = [3, 3], sizes = [1, 1], strides = [1, 1]} : vector<8x4xf32> to vector<1x1xf32>
    %102 = vector.extract_strided_slice %1 {offsets = [48, 0], sizes = [16, 16], strides = [1, 1]} : vector<64x16xf32> to vector<16x16xf32>
    %103 = vector.broadcast %101 : vector<1x1xf32> to vector<16x16xf32>
    %104 = arith.mulf %103, %102 : vector<16x16xf32>
    %105 = arith.addf %100, %104 : vector<16x16xf32>
    %106 = vector.extract_strided_slice %3 {offsets = [0, 3], sizes = [1, 1], strides = [1, 1]} : vector<1x8xf32> to vector<1x1xf32>
    %107 = vector.broadcast %106 : vector<1x1xf32> to vector<16x16xf32>
    %108 = arith.addf %105, %107 : vector<16x16xf32>
    %cst_22 = arith.constant dense<0.000000e+00> : vector<16x32xf32>
    %109 = tpu.matmul %108, %5, %cst_22 {dimension_numbers = #tpu.dot_dimension_numbers<[1], [0], [0], [1], [0, 0, 1, 1], [], []>} : vector<16x16xf32>, vector<16x32xf32>, vector<16x32xf32> -> vector<16x32xf32>
    %cst_23 = arith.constant dense<0.000000e+00> : vector<32x32xf32>
    %110 = tpu.matmul %4, %109, %cst_23 {dimension_numbers = #tpu.dot_dimension_numbers<[1], [0], [0], [1], [0, 0, 1, 1], [], []>} : vector<32x16xf32>, vector<16x32xf32>, vector<32x32xf32> -> vector<32x32xf32>
    %c0_24 = arith.constant 0 : index
    %c96 = arith.constant 96 : index
    %c0_25 = arith.constant 0 : index
    %111 = vector.load %arg6[%c0_24, %c96, %c0_25] : memref<1x256x32xf32, #tpu.memory_space<vmem>>, vector<1x32x32xf32>
    %112 = vector.shape_cast %111 : vector<1x32x32xf32> to vector<32x32xf32>
    %113 = vector.shape_cast %110 : vector<32x32xf32> to vector<1x32x32xf32>
    tpu.vector_store %arg6[%c0_24, %c96, %c0_25], %113 {strides = array<i32>} : memref<1x256x32xf32, #tpu.memory_space<vmem>>, vector<1x32x32xf32>,
    %114 = vector.extract_strided_slice %2 {offsets = [4, 0], sizes = [1, 1], strides = [1, 1]} : vector<8x4xf32> to vector<1x1xf32>
    %115 = vector.extract_strided_slice %1 {offsets = [0, 0], sizes = [16, 16], strides = [1, 1]} : vector<64x16xf32> to vector<16x16xf32>
    %116 = vector.broadcast %114 : vector<1x1xf32> to vector<16x16xf32>
    %117 = arith.mulf %116, %115 : vector<16x16xf32>
    %118 = vector.extract_strided_slice %2 {offsets = [4, 1], sizes = [1, 1], strides = [1, 1]} : vector<8x4xf32> to vector<1x1xf32>
    %119 = vector.extract_strided_slice %1 {offsets = [16, 0], sizes = [16, 16], strides = [1, 1]} : vector<64x16xf32> to vector<16x16xf32>
    %120 = vector.broadcast %118 : vector<1x1xf32> to vector<16x16xf32>
    %121 = arith.mulf %120, %119 : vector<16x16xf32>
    %122 = arith.addf %117, %121 : vector<16x16xf32>
    %123 = vector.extract_strided_slice %2 {offsets = [4, 2], sizes = [1, 1], strides = [1, 1]} : vector<8x4xf32> to vector<1x1xf32>
    %124 = vector.extract_strided_slice %1 {offsets = [32, 0], sizes = [16, 16], strides = [1, 1]} : vector<64x16xf32> to vector<16x16xf32>
    %125 = vector.broadcast %123 : vector<1x1xf32> to vector<16x16xf32>
    %126 = arith.mulf %125, %124 : vector<16x16xf32>
    %127 = arith.addf %122, %126 : vector<16x16xf32>
    %128 = vector.extract_strided_slice %2 {offsets = [4, 3], sizes = [1, 1], strides = [1, 1]} : vector<8x4xf32> to vector<1x1xf32>
    %129 = vector.extract_strided_slice %1 {offsets = [48, 0], sizes = [16, 16], strides = [1, 1]} : vector<64x16xf32> to vector<16x16xf32>
    %130 = vector.broadcast %128 : vector<1x1xf32> to vector<16x16xf32>
    %131 = arith.mulf %130, %129 : vector<16x16xf32>
    %132 = arith.addf %127, %131 : vector<16x16xf32>
    %133 = vector.extract_strided_slice %3 {offsets = [0, 4], sizes = [1, 1], strides = [1, 1]} : vector<1x8xf32> to vector<1x1xf32>
    %134 = vector.broadcast %133 : vector<1x1xf32> to vector<16x16xf32>
    %135 = arith.addf %132, %134 : vector<16x16xf32>
    %cst_26 = arith.constant dense<0.000000e+00> : vector<16x32xf32>
    %136 = tpu.matmul %135, %5, %cst_26 {dimension_numbers = #tpu.dot_dimension_numbers<[1], [0], [0], [1], [0, 0, 1, 1], [], []>} : vector<16x16xf32>, vector<16x32xf32>, vector<16x32xf32> -> vector<16x32xf32>
    %cst_27 = arith.constant dense<0.000000e+00> : vector<32x32xf32>
    %137 = tpu.matmul %4, %136, %cst_27 {dimension_numbers = #tpu.dot_dimension_numbers<[1], [0], [0], [1], [0, 0, 1, 1], [], []>} : vector<32x16xf32>, vector<16x32xf32>, vector<32x32xf32> -> vector<32x32xf32>
    %c0_28 = arith.constant 0 : index
    %c128 = arith.constant 128 : index
    %c0_29 = arith.constant 0 : index
    %138 = vector.load %arg6[%c0_28, %c128, %c0_29] : memref<1x256x32xf32, #tpu.memory_space<vmem>>, vector<1x32x32xf32>
    %139 = vector.shape_cast %138 : vector<1x32x32xf32> to vector<32x32xf32>
    %140 = vector.shape_cast %137 : vector<32x32xf32> to vector<1x32x32xf32>
    tpu.vector_store %arg6[%c0_28, %c128, %c0_29], %140 {strides = array<i32>} : memref<1x256x32xf32, #tpu.memory_space<vmem>>, vector<1x32x32xf32>,
    %141 = vector.extract_strided_slice %2 {offsets = [5, 0], sizes = [1, 1], strides = [1, 1]} : vector<8x4xf32> to vector<1x1xf32>
    %142 = vector.extract_strided_slice %1 {offsets = [0, 0], sizes = [16, 16], strides = [1, 1]} : vector<64x16xf32> to vector<16x16xf32>
    %143 = vector.broadcast %141 : vector<1x1xf32> to vector<16x16xf32>
    %144 = arith.mulf %143, %142 : vector<16x16xf32>
    %145 = vector.extract_strided_slice %2 {offsets = [5, 1], sizes = [1, 1], strides = [1, 1]} : vector<8x4xf32> to vector<1x1xf32>
    %146 = vector.extract_strided_slice %1 {offsets = [16, 0], sizes = [16, 16], strides = [1, 1]} : vector<64x16xf32> to vector<16x16xf32>
    %147 = vector.broadcast %145 : vector<1x1xf32> to vector<16x16xf32>
    %148 = arith.mulf %147, %146 : vector<16x16xf32>
    %149 = arith.addf %144, %148 : vector<16x16xf32>
    %150 = vector.extract_strided_slice %2 {offsets = [5, 2], sizes = [1, 1], strides = [1, 1]} : vector<8x4xf32> to vector<1x1xf32>
    %151 = vector.extract_strided_slice %1 {offsets = [32, 0], sizes = [16, 16], strides = [1, 1]} : vector<64x16xf32> to vector<16x16xf32>
    %152 = vector.broadcast %150 : vector<1x1xf32> to vector<16x16xf32>
    %153 = arith.mulf %152, %151 : vector<16x16xf32>
    %154 = arith.addf %149, %153 : vector<16x16xf32>
    %155 = vector.extract_strided_slice %2 {offsets = [5, 3], sizes = [1, 1], strides = [1, 1]} : vector<8x4xf32> to vector<1x1xf32>
    %156 = vector.extract_strided_slice %1 {offsets = [48, 0], sizes = [16, 16], strides = [1, 1]} : vector<64x16xf32> to vector<16x16xf32>
    %157 = vector.broadcast %155 : vector<1x1xf32> to vector<16x16xf32>
    %158 = arith.mulf %157, %156 : vector<16x16xf32>
    %159 = arith.addf %154, %158 : vector<16x16xf32>
    %160 = vector.extract_strided_slice %3 {offsets = [0, 5], sizes = [1, 1], strides = [1, 1]} : vector<1x8xf32> to vector<1x1xf32>
    %161 = vector.broadcast %160 : vector<1x1xf32> to vector<16x16xf32>
    %162 = arith.addf %159, %161 : vector<16x16xf32>
    %cst_30 = arith.constant dense<0.000000e+00> : vector<16x32xf32>
    %163 = tpu.matmul %162, %5, %cst_30 {dimension_numbers = #tpu.dot_dimension_numbers<[1], [0], [0], [1], [0, 0, 1, 1], [], []>} : vector<16x16xf32>, vector<16x32xf32>, vector<16x32xf32> -> vector<16x32xf32>
    %cst_31 = arith.constant dense<0.000000e+00> : vector<32x32xf32>
    %164 = tpu.matmul %4, %163, %cst_31 {dimension_numbers = #tpu.dot_dimension_numbers<[1], [0], [0], [1], [0, 0, 1, 1], [], []>} : vector<32x16xf32>, vector<16x32xf32>, vector<32x32xf32> -> vector<32x32xf32>
    %c0_32 = arith.constant 0 : index
    %c160 = arith.constant 160 : index
    %c0_33 = arith.constant 0 : index
    %165 = vector.load %arg6[%c0_32, %c160, %c0_33] : memref<1x256x32xf32, #tpu.memory_space<vmem>>, vector<1x32x32xf32>
    %166 = vector.shape_cast %165 : vector<1x32x32xf32> to vector<32x32xf32>
    %167 = vector.shape_cast %164 : vector<32x32xf32> to vector<1x32x32xf32>
    tpu.vector_store %arg6[%c0_32, %c160, %c0_33], %167 {strides = array<i32>} : memref<1x256x32xf32, #tpu.memory_space<vmem>>, vector<1x32x32xf32>,
    %168 = vector.extract_strided_slice %2 {offsets = [6, 0], sizes = [1, 1], strides = [1, 1]} : vector<8x4xf32> to vector<1x1xf32>
    %169 = vector.extract_strided_slice %1 {offsets = [0, 0], sizes = [16, 16], strides = [1, 1]} : vector<64x16xf32> to vector<16x16xf32>
    %170 = vector.broadcast %168 : vector<1x1xf32> to vector<16x16xf32>
    %171 = arith.mulf %170, %169 : vector<16x16xf32>
    %172 = vector.extract_strided_slice %2 {offsets = [6, 1], sizes = [1, 1], strides = [1, 1]} : vector<8x4xf32> to vector<1x1xf32>
    %173 = vector.extract_strided_slice %1 {offsets = [16, 0], sizes = [16, 16], strides = [1, 1]} : vector<64x16xf32> to vector<16x16xf32>
    %174 = vector.broadcast %172 : vector<1x1xf32> to vector<16x16xf32>
    %175 = arith.mulf %174, %173 : vector<16x16xf32>
    %176 = arith.addf %171, %175 : vector<16x16xf32>
    %177 = vector.extract_strided_slice %2 {offsets = [6, 2], sizes = [1, 1], strides = [1, 1]} : vector<8x4xf32> to vector<1x1xf32>
    %178 = vector.extract_strided_slice %1 {offsets = [32, 0], sizes = [16, 16], strides = [1, 1]} : vector<64x16xf32> to vector<16x16xf32>
    %179 = vector.broadcast %177 : vector<1x1xf32> to vector<16x16xf32>
    %180 = arith.mulf %179, %178 : vector<16x16xf32>
    %181 = arith.addf %176, %180 : vector<16x16xf32>
    %182 = vector.extract_strided_slice %2 {offsets = [6, 3], sizes = [1, 1], strides = [1, 1]} : vector<8x4xf32> to vector<1x1xf32>
    %183 = vector.extract_strided_slice %1 {offsets = [48, 0], sizes = [16, 16], strides = [1, 1]} : vector<64x16xf32> to vector<16x16xf32>
    %184 = vector.broadcast %182 : vector<1x1xf32> to vector<16x16xf32>
    %185 = arith.mulf %184, %183 : vector<16x16xf32>
    %186 = arith.addf %181, %185 : vector<16x16xf32>
    %187 = vector.extract_strided_slice %3 {offsets = [0, 6], sizes = [1, 1], strides = [1, 1]} : vector<1x8xf32> to vector<1x1xf32>
    %188 = vector.broadcast %187 : vector<1x1xf32> to vector<16x16xf32>
    %189 = arith.addf %186, %188 : vector<16x16xf32>
    %cst_34 = arith.constant dense<0.000000e+00> : vector<16x32xf32>
    %190 = tpu.matmul %189, %5, %cst_34 {dimension_numbers = #tpu.dot_dimension_numbers<[1], [0], [0], [1], [0, 0, 1, 1], [], []>} : vector<16x16xf32>, vector<16x32xf32>, vector<16x32xf32> -> vector<16x32xf32>
    %cst_35 = arith.constant dense<0.000000e+00> : vector<32x32xf32>
    %191 = tpu.matmul %4, %190, %cst_35 {dimension_numbers = #tpu.dot_dimension_numbers<[1], [0], [0], [1], [0, 0, 1, 1], [], []>} : vector<32x16xf32>, vector<16x32xf32>, vector<32x32xf32> -> vector<32x32xf32>
    %c0_36 = arith.constant 0 : index
    %c192 = arith.constant 192 : index
    %c0_37 = arith.constant 0 : index
    %192 = vector.load %arg6[%c0_36, %c192, %c0_37] : memref<1x256x32xf32, #tpu.memory_space<vmem>>, vector<1x32x32xf32>
    %193 = vector.shape_cast %192 : vector<1x32x32xf32> to vector<32x32xf32>
    %194 = vector.shape_cast %191 : vector<32x32xf32> to vector<1x32x32xf32>
    tpu.vector_store %arg6[%c0_36, %c192, %c0_37], %194 {strides = array<i32>} : memref<1x256x32xf32, #tpu.memory_space<vmem>>, vector<1x32x32xf32>,
    %195 = vector.extract_strided_slice %2 {offsets = [7, 0], sizes = [1, 1], strides = [1, 1]} : vector<8x4xf32> to vector<1x1xf32>
    %196 = vector.extract_strided_slice %1 {offsets = [0, 0], sizes = [16, 16], strides = [1, 1]} : vector<64x16xf32> to vector<16x16xf32>
    %197 = vector.broadcast %195 : vector<1x1xf32> to vector<16x16xf32>
    %198 = arith.mulf %197, %196 : vector<16x16xf32>
    %199 = vector.extract_strided_slice %2 {offsets = [7, 1], sizes = [1, 1], strides = [1, 1]} : vector<8x4xf32> to vector<1x1xf32>
    %200 = vector.extract_strided_slice %1 {offsets = [16, 0], sizes = [16, 16], strides = [1, 1]} : vector<64x16xf32> to vector<16x16xf32>
    %201 = vector.broadcast %199 : vector<1x1xf32> to vector<16x16xf32>
    %202 = arith.mulf %201, %200 : vector<16x16xf32>
    %203 = arith.addf %198, %202 : vector<16x16xf32>
    %204 = vector.extract_strided_slice %2 {offsets = [7, 2], sizes = [1, 1], strides = [1, 1]} : vector<8x4xf32> to vector<1x1xf32>
    %205 = vector.extract_strided_slice %1 {offsets = [32, 0], sizes = [16, 16], strides = [1, 1]} : vector<64x16xf32> to vector<16x16xf32>
    %206 = vector.broadcast %204 : vector<1x1xf32> to vector<16x16xf32>
    %207 = arith.mulf %206, %205 : vector<16x16xf32>
    %208 = arith.addf %203, %207 : vector<16x16xf32>
    %209 = vector.extract_strided_slice %2 {offsets = [7, 3], sizes = [1, 1], strides = [1, 1]} : vector<8x4xf32> to vector<1x1xf32>
    %210 = vector.extract_strided_slice %1 {offsets = [48, 0], sizes = [16, 16], strides = [1, 1]} : vector<64x16xf32> to vector<16x16xf32>
    %211 = vector.broadcast %209 : vector<1x1xf32> to vector<16x16xf32>
    %212 = arith.mulf %211, %210 : vector<16x16xf32>
    %213 = arith.addf %208, %212 : vector<16x16xf32>
    %214 = vector.extract_strided_slice %3 {offsets = [0, 7], sizes = [1, 1], strides = [1, 1]} : vector<1x8xf32> to vector<1x1xf32>
    %215 = vector.broadcast %214 : vector<1x1xf32> to vector<16x16xf32>
    %216 = arith.addf %213, %215 : vector<16x16xf32>
    %cst_38 = arith.constant dense<0.000000e+00> : vector<16x32xf32>
    %217 = tpu.matmul %216, %5, %cst_38 {dimension_numbers = #tpu.dot_dimension_numbers<[1], [0], [0], [1], [0, 0, 1, 1], [], []>} : vector<16x16xf32>, vector<16x32xf32>, vector<16x32xf32> -> vector<16x32xf32>
    %cst_39 = arith.constant dense<0.000000e+00> : vector<32x32xf32>
    %218 = tpu.matmul %4, %217, %cst_39 {dimension_numbers = #tpu.dot_dimension_numbers<[1], [0], [0], [1], [0, 0, 1, 1], [], []>} : vector<32x16xf32>, vector<16x32xf32>, vector<32x32xf32> -> vector<32x32xf32>
    %c0_40 = arith.constant 0 : index
    %c224 = arith.constant 224 : index
    %c0_41 = arith.constant 0 : index
    %219 = vector.load %arg6[%c0_40, %c224, %c0_41] : memref<1x256x32xf32, #tpu.memory_space<vmem>>, vector<1x32x32xf32>
    %220 = vector.shape_cast %219 : vector<1x32x32xf32> to vector<32x32xf32>
    %221 = vector.shape_cast %218 : vector<32x32xf32> to vector<1x32x32xf32>
    tpu.vector_store %arg6[%c0_40, %c224, %c0_41], %221 {strides = array<i32>} : memref<1x256x32xf32, #tpu.memory_space<vmem>>, vector<1x32x32xf32>,
    return
  }
  func.func @transform_0(%arg0: i32) -> (i32, i32, i32) {
    %c0_i32 = arith.constant 0 : i32
    %c0_i32_0 = arith.constant 0 : i32
    %c0_i32_1 = arith.constant 0 : i32
    return %arg0, %c0_i32, %c0_i32_0 : i32, i32, i32
  }
  func.func @transform_1(%arg0: i32) -> (i32, i32) {
    %c0_i32 = arith.constant 0 : i32
    %c0_i32_0 = arith.constant 0 : i32
    %c0_i32_1 = arith.constant 0 : i32
    return %c0_i32, %c0_i32_0 : i32, i32
  }
  func.func @transform_2(%arg0: i32) -> (i32, i32) {
    %c0_i32 = arith.constant 0 : i32
    %c0_i32_0 = arith.constant 0 : i32
    %c0_i32_1 = arith.constant 0 : i32
    return %c0_i32, %c0_i32_0 : i32, i32
  }
  func.func @transform_3(%arg0: i32) -> (i32, i32) {
    %c0_i32 = arith.constant 0 : i32
    %c0_i32_0 = arith.constant 0 : i32
    %c0_i32_1 = arith.constant 0 : i32
    return %c0_i32, %c0_i32_0 : i32, i32
  }
  func.func @transform_4(%arg0: i32) -> (i32, i32) {
    %c0_i32 = arith.constant 0 : i32
    %c0_i32_0 = arith.constant 0 : i32
    %c0_i32_1 = arith.constant 0 : i32
    return %c0_i32, %c0_i32_0 : i32, i32
  }
  func.func @transform_5(%arg0: i32) -> (i32, i32, i32) {
    %c0_i32 = arith.constant 0 : i32
    %c0_i32_0 = arith.constant 0 : i32
    %c0_i32_1 = arith.constant 0 : i32
    return %arg0, %c0_i32, %c0_i32_0 : i32, i32, i32
  }
}

</mosaic_0001>

<bundles_post_ra>
// kernel: tpu_custom_call.1
= control target key start
LH: loop header
LB: loop body
LE: loop exit
PB: predicated region body
PF: predicated region fallthrough
CT: control target
= control target key end

     0   :  { %s2469_s18 = smov 0   ;;  %s2877_s0 = inlined_call_operand.vmem [shape: f32[2,64,16], index: 0, kind: input, shape index: {}]   ;;  %s2878_s1 = inlined_call_operand.vmem [shape: f32[8,4], index: 1, kind: input, shape index: {}]   ;;  %s2879_s2 = inlined_call_operand.vmem [shape: f32[1,8], index: 2, kind: input, shape index: {}]   ;;  %s2880_s3 = inlined_call_operand.vmem [shape: f32[32,16], index: 3, kind: input, shape index: {}]   ;;  %s2881_s4 = inlined_call_operand.vmem [shape: f32[16,32], index: 4, kind: input, shape index: {}]   ;;  %s2882_s5 = inlined_call_operand.vmem [shape: f32[2,256,32], index: 5, kind: output, shape index: {}]  }
   0x1 LB: > { %s1987_s19 = sadd.s32 4294967295, %s2426_s18   ;;  %p1991_p0 = scmp.ge.s32.totalorder %s2426_s18, 1  ;;  %s2426_s18 = sphi %s2469_s18, %s15_s18  }
   0x2   : > { %p187_p1 = scmp.lt.s32.totalorder %s2426_s18, 3 }
   0x4   : > { %p188_p2 = pnand %p1991_p0, %p187_p1 }
   0x5   : > { %v2480_v0 = vld [vmem:[%s2878_s1] sm:$0xff] (!%p188_p2)  ;;  %s2428_s22 = smov (!%p188_p2), 127   ;;  %s2429_s23 = smov (!%p188_p2), 125   ;;  %v2430_v2 = vmov (!%p188_p2), 0   ;;  %v2431_v3 = vmov (!%p188_p2), 1   ;;  %v240_v6 = vld [vmem:[%s2881_s4 + $0x8] sm:$0xff] (!%p188_p2) }
   0x6   : > { %191 = sbr.rel (%p188_p2) target bundleno = 1309 (0x51d), region = 40  ;;  %247 = vrot.lane.b32.xlu0 (!%p188_p2), %v2480_v0, %s2428_s22  ;;  %265 = vrot.lane.b32.xlu1 (!%p188_p2), %v2480_v0, %s2429_s23  ;;  %v469_v1 = vrot.slane (!%p188_p2), %v2480_v0, 1  ;;  %2329 = vpush (!%p188_p2), %v2480_v0  ;;  %s2432_s24 = smov (!%p188_p2), 126   ;;  %v2496_v4 = vld [vmem:[%s2879_s2] ss:$0 sm:$0xff] (!%p188_p2)  ;;  %v678_v8 = vrot.slane (!%p188_p2), %v2480_v0, 2 }
   0x7   : > { %2412 = vset.pattern.permute.xlu0 (!%p188_p2), %v2430_v2  ;;  %2413 = vset.pattern.permute.xlu1 (!%p188_p2), %v2431_v3  ;;  %v239_v5 = vld [vmem:[%s2881_s4] sm:$0xff] (!%p188_p2)  ;;  %v2433_v9 = vmov (!%p188_p2), 2   ;;  %v2434_v10 = vmov (!%p188_p2), 3   ;;  %v2516_v11 = vrot.slane (!%p188_p2), %v2480_v0, 3  ;;  %p215_p3 = scmp.lt.s32.totalorder (!%p188_p2), %s1987_s19, 1  ;;  %vm285_vm0 = vcmask (!%p188_p2), 130048  }
   0x8   : > { %v2506_v7 = vpack.c.bf16 (!%p188_p2), %v240_v6, %v239_v5  ;;  %vm464_vm1 = vcmask (!%p188_p2), 261120  }
   0xa   : > { %256 = vrot.lane.b32.xlu0 (!%p188_p2), %v2480_v0, %s2432_s24  ;;  %475 = vrot.lane.b32.xlu1 (!%p188_p2), %v469_v1, %s2428_s22 }
   0xb   : > { %2266 = vmatprep.subr.bf16.mxu1 (!%p188_p2), %v2506_v7  ;;  %2274 = vmatprep.subr.bf16.mxu0 (!%p188_p2), %v2506_v7 }
   0xc   : > { %2268 = vmatpush3.bf16.msra.mxu1 (!%p188_p2), %v2506_v7  ;;  %2276 = vmatpush3.bf16.msra.mxu0 (!%p188_p2), %v2506_v7 }
   0xd   : > { %s2884_s19 = smov (!%p215_p3, %s1987_s19), 1 }
   0xe   : > { %484 = vrot.lane.b32.xlu0 %v469_v1, %s2432_s24  ;;  %493 = vrot.lane.b32.xlu1 %v469_v1, %s2429_s23  ;;  %s2047_s6 = sshll.u32 %s2884_s19, 6 }
   0xf   : > { %s219_s9 = scalar_lea.vmem %s2877_s0, %s2047_s6 }
  0x10   : > { %v2537_v18 = vld [vmem:[%s219_s9] sm:$0xff]  ;;  %v2539_v20 = vld [vmem:[%s219_s9 + $0x8] sm:$0xff]  ;;  %v2541_v21 = vld [vmem:[%s219_s9 + $0x10] sm:$0xff] }
  0x11   : > { %v2543_v22 = vld [vmem:[%s219_s9 + $0x18] sm:$0xff]  ;;  %v2549_v28 = vld [vmem:[%s219_s9 + $0x20] sm:$0xff]  ;;  %v2551_v29 = vld [vmem:[%s219_s9 + $0x28] sm:$0xff] }
  0x12   : > { %280 = vperm.xlu0 %2412, %v2496_v4   ;;  %503 = vperm.xlu1 %2413, %v2496_v4   ;;  %v2553_v30 = vld [vmem:[%s219_s9 + $0x38] sm:$0xff]  ;;  %v2557_v38 = vld [vmem:[%s219_s9 + $0x30] sm:$0xff] }
  0x16   : > { %2414 = vset.pattern.permute.xlu1 %v2433_v9  ;;  %2415 = vset.pattern.permute.xlu0 %v2434_v10 }
  0x17   : > { %684 = vrot.lane.b32.xlu1 %v678_v8, %s2428_s22  ;;  %693 = vrot.lane.b32.xlu0 %v678_v8, %s2432_s24 }
  0x1b   : > { %702 = vrot.lane.b32.xlu1 %v678_v8, %s2429_s23  ;;  %893 = vrot.lane.b32.xlu0 %v2516_v11, %s2428_s22 }
  0x1f   : > { %902 = vrot.lane.b32.xlu1 %v2516_v11, %s2432_s24  ;;  %911 = vrot.lane.b32.xlu0 %v2516_v11, %s2429_s23 }
  0x23   : > { %712 = vperm.xlu1 %2414, %v2496_v4   ;;  %921 = vperm.xlu0 %2415, %v2496_v4  }
  0x37   : > { %s2330_s10 = spop %2329 }
  0x38   : > { %v243_v19 = vstv %s2330_s10 }
  0x39   : > { %v245_v23 = vmul.f32 %v243_v19, %v2537_v18  ;;  %v246_v25 = vmul.f32 %v243_v19, %v2539_v20 }
  0x78   : > { %v248_v12 = vpop.permute.xlu0 %247  ;;  %v266_v13 = vpop.permute.xlu1 %265 }
  0x79   : > { %2331 = vpush %v248_v12 }
  0x7c   : > { %v257_v14 = vpop.permute.xlu0 %256  ;;  %v476_v15 = vpop.permute.xlu1 %475 }
  0x7d   : > { %2333 = vpush %v257_v14  ;;  %v2577_v14 = vld [vmem:[%s2880_s3] sm:$0xff] }
  0x7e   : > { %2335 = vpush %v266_v13 }
  0x7f   : > { %2337 = vpush %v469_v1 }
  0x80   : > { %2339 = vpush %v476_v15  ;;  %v485_v16 = vpop.permute.xlu0 %484  ;;  %v494_v17 = vpop.permute.xlu1 %493  ;;  %v2435_v15 = vmov 4  }
  0x81   : > { %2341 = vpush %v485_v16  ;;  %2416 = vset.pattern.permute.xlu0 %v2435_v15  ;;  %v2436_v16 = vmov 5  }
  0x82   : > { %2343 = vpush %v494_v17  ;;  %2417 = vset.pattern.permute.xlu1 %v2436_v16  ;;  %v2587_v17 = vrot.slane %v2480_v0, 5 }
  0x83   : > { %2345 = vpush %v678_v8 }
  0x91   : > { %v281_v33 = vpop.permute.xlu0 %280  ;;  %v504_v34 = vpop.permute.xlu1 %503 }
  0x95   : > { %v685_v49 = vpop.permute.xlu1 %684  ;;  %v694_v50 = vpop.permute.xlu0 %693 }
  0x96   : > { %2347 = vpush %v685_v49 }
  0x97   : > { %2349 = vpush %v694_v50 }
  0x99   : > { %v703_v1 = vpop.permute.xlu1 %702  ;;  %v894_v2 = vpop.permute.xlu0 %893 }
  0x9a   : > { %2351 = vpush %v703_v1 }
  0x9b   : > { %2353 = vpush %v2516_v11  ;;  %v1096_v11 = vrot.slane %v2480_v0, 4 }
  0x9c   : > { %2355 = vpush %v894_v2 }
  0x9d   : > { %v903_v9 = vpop.permute.xlu1 %902  ;;  %v912_v10 = vpop.permute.xlu0 %911  ;;  %1102 = vrot.lane.b32.xlu1 %v1096_v11, %s2428_s22  ;;  %1120 = vrot.lane.b32.xlu0 %v1096_v11, %s2429_s23 }
  0x9e   : > { %2357 = vpush %v903_v9  ;;  %v2638_v9 = vld [vmem:[%s2880_s3 + $0x18] sm:$0xff] }
  0x9f   : > { %2359 = vpush %v912_v10 }
  0xa0   : > { %2361 = vpush %v1096_v11 }
  0xa1   : > { %1111 = vrot.lane.b32.xlu1 %v1096_v11, %s2432_s24  ;;  %1320 = vrot.lane.b32.xlu0 %v2587_v17, %s2432_s24 }
  0xa5   : > { %1311 = vrot.lane.b32.xlu1 %v2587_v17, %s2428_s22  ;;  %1130 = vperm.xlu0 %2416, %v2496_v4  }
  0xa9   : > { %1329 = vrot.lane.b32.xlu1 %v2587_v17, %s2429_s23 }
  0xaa   : > { %s2332_s11 = spop %2331 }
  0xab   : > { %v250_v24 = vstv %s2332_s11 }
  0xac   : > { %v252_v26 = vmul.f32 %v250_v24, %v2541_v21  ;;  %v253_v27 = vmul.f32 %v250_v24, %v2543_v22 }
  0xad   : > { %1339 = vperm.xlu1 %2417, %v2496_v4  }
  0xae   : > { %s2334_s12 = spop %2333  ;;  %v254_v31 = vadd.f32 %v252_v26, %v245_v23  ;;  %v255_v35 = vadd.f32 %v253_v27, %v246_v25 }
  0xaf   : > { %v259_v32 = vstv %s2334_s12  ;;  %s2336_s13 = spop %2335 }
  0xb0   : > { %v261_v36 = vmul.f32 %v259_v32, %v2549_v28  ;;  %v262_v37 = vmul.f32 %v259_v32, %v2551_v29  ;;  %v268_v39 = vstv %s2336_s13  ;;  %s2338_s14 = spop %2337 }
  0xb1   : > { %v271_v40 = vmul.f32 %v268_v39, %v2553_v30  ;;  %v471_v41 = vstv %s2338_s14  ;;  %s2340_s15 = spop %2339  ;;  %v270_v46 = vmul.f32 %v268_v39, %v2557_v38 }
  0xb2   : > { %v263_v42 = vadd.f32 %v261_v36, %v254_v31  ;;  %v264_v43 = vadd.f32 %v262_v37, %v255_v35  ;;  %v473_v44 = vmul.f32 %v471_v41, %v2537_v18  ;;  %v474_v45 = vmul.f32 %v471_v41, %v2539_v20  ;;  %s2342_s16 = spop %2341 }
  0xb3   : > { %v478_v47 = vstv %s2340_s15  ;;  %v487_v48 = vstv %s2342_s16  ;;  %s2344_s17 = spop %2343  ;;  %s2048_s15 = sshll.u32 %s2884_s19, 8 }
  0xb4   : > { %v273_v51 = vadd.f32 %v271_v40, %v264_v43  ;;  %v480_v52 = vmul.f32 %v478_v47, %v2541_v21  ;;  %v481_v53 = vmul.f32 %v478_v47, %v2543_v22  ;;  %v489_v54 = vmul.f32 %v487_v48, %v2549_v28  ;;  %s2346_s25 = spop %2345 }
  0xb5   : > { %v490_v55 = vmul.f32 %v487_v48, %v2551_v29  ;;  %v496_v56 = vstv %s2344_s17  ;;  %v272_v57 = vadd.f32 %v270_v46, %v263_v42  ;;  %v680_v19 = vstv %s2346_s25 }
  0xb6   : > { %v482_v58 = vadd.f32 %v480_v52, %v473_v44  ;;  %v483_v59 = vadd.f32 %v481_v53, %v474_v45  ;;  %v498_v60 = vmul.f32 %v496_v56, %v2557_v38  ;;  %v499_v61 = vmul.f32 %v496_v56, %v2553_v30  ;;  %v2619_v56 = vld [vmem:[%s2880_s3 + $0x8] sm:$0xff] }
  0xb7   : > { %v284_v62 = vadd.f32 %v281_v33, %v273_v51  ;;  %v283_v63 = vadd.f32 %v281_v33, %v272_v57  ;;  %v682_v24 = vmul.f32 %v680_v19, %v2537_v18  ;;  %v683_v32 = vmul.f32 %v680_v19, %v2539_v20 }
  0xb8   : > { %v491_v3 = vadd.f32 %v489_v54, %v482_v58  ;;  %v492_v5 = vadd.f32 %v490_v55, %v483_v59  ;;  %v713_v58 = vpop.permute.xlu1 %712 }
  0xb9   : > { %2133 = vmatprep.mubr.msk.f32.mxu1 %vm285_vm0, %v283_v63  ;;  %v2626_v63 = vld [vmem:[%s2880_s3 + $0x10] sm:$0xff] }
  0xba   : > { %v501_v6 = vadd.f32 %v499_v61, %v492_v5  ;;  %2134 = vmatmul.mubr.msk.f32.vlgmr.msra.gmra.mrb[0].mxu1 %vm285_vm0, %v284_v62  ;;  %v500_v8 = vadd.f32 %v498_v60, %v491_v3  ;;  %v922_v3 = vpop.permute.xlu0 %921 }
  0xbb   : > { %2140 = vmatprep.mubr.msk.f32.mxu1 %vm285_vm0, %v2577_v14 }
  0xbc   : > { %v507_v12 = vadd.f32 %v504_v34, %v501_v6  ;;  %v506_v13 = vadd.f32 %v504_v34, %v500_v8 }
  0xbe   : > { %2150 = vmatprep.mubr.msk.f32.mxu0 %vm285_vm0, %v506_v13 }
  0xbf   : > { %2151 = vmatmul.mubr.msk.f32.vlgmr.msra.gmra.mrb[0].mxu0 %vm285_vm0, %v507_v12 }
  0xc0   : > { %2157 = vmatprep.mubr.msk.f32.mxu0 %vm285_vm0, %v2577_v14 }
  0xc7   : > { %s2348_s26 = spop %2347 }
  0xc8   : > { %s2350_s27 = spop %2349  ;;  %v687_v23 = vstv %s2348_s26 }
  0xc9   : > { %v689_v25 = vmul.f32 %v687_v23, %v2541_v21  ;;  %v696_v26 = vstv %s2350_s27  ;;  %v690_v35 = vmul.f32 %v687_v23, %v2543_v22 }
  0xca   : > { %v698_v34 = vmul.f32 %v696_v26, %v2549_v28  ;;  %v699_v42 = vmul.f32 %v696_v26, %v2551_v29 }
  0xcb   : > { %s2598_s28 = spop %2351  ;;  %v691_v33 = vadd.f32 %v689_v25, %v682_v24  ;;  %v692_v49 = vadd.f32 %v690_v35, %v683_v32  ;;  %v2438_v32 = vmov 7  }
  0xcc   : > { %s2354_s29 = spop %2353  ;;  %v705_v36 = vstv %s2598_s28  ;;  %2419 = vset.pattern.permute.xlu0 %v2438_v32 }
  0xcd   : > { %s2356_s30 = spop %2355  ;;  %v889_v27 = vstv %s2354_s29  ;;  %v700_v44 = vadd.f32 %v698_v34, %v691_v33  ;;  %v707_v45 = vmul.f32 %v705_v36, %v2557_v38  ;;  %v701_v59 = vadd.f32 %v699_v42, %v692_v49 }
  0xce   : > { %v896_v31 = vstv %s2356_s30  ;;  %v891_v37 = vmul.f32 %v889_v27, %v2537_v18  ;;  %v892_v46 = vmul.f32 %v889_v27, %v2539_v20  ;;  %v708_v61 = vmul.f32 %v705_v36, %v2553_v30 }
  0xcf   : > { %s2358_s6 = spop %2357  ;;  %v898_v39 = vmul.f32 %v896_v31, %v2541_v21  ;;  %v899_v47 = vmul.f32 %v896_v31, %v2543_v22  ;;  %v709_v54 = vadd.f32 %v707_v45, %v700_v44  ;;  %v2437_v31 = vmov 6  }
  0xd0   : > { %v905_v40 = vstv %s2358_s6  ;;  %s2609_s7 = spop %2359  ;;  %v710_v12 = vadd.f32 %v708_v61, %v701_v59  ;;  %2418 = vset.pattern.permute.xlu1 %v2437_v31  ;;  %v2664_v33 = vrot.slane %v2480_v0, 7 }
  0xd1   : > { %v900_v50 = vadd.f32 %v898_v39, %v891_v37  ;;  %v907_v51 = vmul.f32 %v905_v40, %v2549_v28  ;;  %v914_v52 = vstv %s2609_s7  ;;  %v901_v55 = vadd.f32 %v899_v47, %v892_v46  ;;  %s2362_s14 = spop %2361 }
  0xd2   : > { %v908_v57 = vmul.f32 %v905_v40, %v2551_v29  ;;  %v916_v1 = vmul.f32 %v914_v52, %v2557_v38  ;;  %v715_v6 = vadd.f32 %v713_v58, %v709_v54  ;;  %v917_v8 = vmul.f32 %v914_v52, %v2553_v30 }
  0xd3   : > { %v909_v62 = vadd.f32 %v907_v51, %v900_v50  ;;  %v716_v19 = vadd.f32 %v713_v58, %v710_v12 }
  0xd4   : > { %v910_v5 = vadd.f32 %v908_v57, %v901_v55 }
  0xd5   : > { %v918_v13 = vadd.f32 %v916_v1, %v909_v62 }
  0xd6   : > { %v919_v15 = vadd.f32 %v917_v8, %v910_v5 }
  0xd7   : > { %v924_v23 = vadd.f32 %v922_v3, %v918_v13 }
  0xd8   : > { %v925_v25 = vadd.f32 %v922_v3, %v919_v15 }
 0x10f   : > { %v1103_v10 = vpop.permute.xlu1 %1102  ;;  %v1121_v11 = vpop.permute.xlu0 %1120 }
 0x110   : > { %2363 = vpush %v1103_v10 }
 0x113   : > { %v1112_v16 = vpop.permute.xlu1 %1111  ;;  %v1321_v24 = vpop.permute.xlu0 %1320 }
 0x114   : > { %2365 = vpush %v1112_v16 }
 0x115   : > { %2367 = vpush %v1121_v11 }
 0x116   : > { %2369 = vpush %v2587_v17  ;;  %v1514_v17 = vrot.slane %v2480_v0, 6 }
 0x117   : > { %v1312_v26 = vpop.permute.xlu1 %1311 }
 0x118   : > { %2371 = vpush %v1312_v26  ;;  %1520 = vrot.lane.b32.xlu1 %v1514_v17, %s2428_s22  ;;  %1529 = vrot.lane.b32.xlu0 %v1514_v17, %s2432_s24 }
 0x119   : > { %2373 = vpush %v1321_v24 }
 0x11b   : > { %v1330_v27 = vpop.permute.xlu1 %1329 }
 0x11c   : > { %2375 = vpush %v1330_v27  ;;  %1538 = vrot.lane.b32.xlu1 %v1514_v17, %s2429_s23  ;;  %1729 = vrot.lane.b32.xlu0 %v2664_v33, %s2428_s22  ;;  %s2683_s22 = scalar_lea.vmem %s2882_s5, %s2048_s15 }
 0x11d   : > { %2377 = vpush %v1514_v17 }
 0x120   : > { %1738 = vrot.lane.b32.xlu1 %v2664_v33, %s2432_s24  ;;  %1747 = vrot.lane.b32.xlu0 %v2664_v33, %s2429_s23 }
 0x124   : > { %1548 = vperm.xlu1 %2418, %v2496_v4   ;;  %1757 = vperm.xlu0 %2419, %v2496_v4   ;;  %v1098_v4 = vstv %s2362_s14  ;;  %v1131_v10 = vpop.permute.xlu0 %1130 }
 0x125   : > { %v1100_v36 = vmul.f32 %v1098_v4, %v2537_v18  ;;  %v1101_v45 = vmul.f32 %v1098_v4, %v2539_v20 }
 0x12c   : > { %v1340_v15 = vpop.permute.xlu1 %1339 }
 0x141   : > { %s2364_s16 = spop %2363 }
 0x142   : > { %v1105_v34 = vstv %s2364_s16 }
 0x143   : > { %v1107_v37 = vmul.f32 %v1105_v34, %v2541_v21  ;;  %v1108_v46 = vmul.f32 %v1105_v34, %v2543_v22 }
 0x145   : > { %s2676_s17 = spop %2365  ;;  %v1109_v50 = vadd.f32 %v1107_v37, %v1100_v36  ;;  %v1110_v55 = vadd.f32 %v1108_v46, %v1101_v45 }
 0x146   : > { %s2678_s20 = spop %2367  ;;  %v1114_v42 = vstv %s2676_s17 }
 0x147   : > { %s2685_s23 = spop %2369  ;;  %v1116_v51 = vmul.f32 %v1114_v42, %v2549_v28  ;;  %v1123_v54 = vstv %s2678_s20  ;;  %v1117_v1 = vmul.f32 %v1114_v42, %v2551_v29 }
 0x148   : > { %v1307_v39 = vstv %s2685_s23 }
 0x149   : > { %s2687_s19 = spop %2371  ;;  %v1310_v59 = vmul.f32 %v1307_v39, %v2539_v20  ;;  %v1118_v5 = vadd.f32 %v1116_v51, %v1109_v50  ;;  %v1119_v16 = vadd.f32 %v1117_v1, %v1110_v55 }
 0x14a   : > { %v1314_v40 = vstv %s2687_s19  ;;  %s2698_s24 = spop %2373 }
 0x14b   : > { %v1316_v49 = vmul.f32 %v1314_v40, %v2541_v21  ;;  %v1323_v52 = vstv %s2698_s24 }
 0x14c   : > { %v1325_v3 = vmul.f32 %v1323_v52, %v2549_v28  ;;  %v1326_v11 = vmul.f32 %v1323_v52, %v2551_v29 }
 0x14d   : > { %s2715_s26 = spop %2375 }
 0x14e   : > { %v1332_v8 = vstv %s2715_s26  ;;  %s2378_s27 = spop %2377 }
 0x14f   : > { %v1335_v31 = vmul.f32 %v1332_v8, %v2553_v30 }
 0x18a   : > { %v1521_v32 = vpop.permute.xlu1 %1520 }
 0x18b   : > { %2379 = vpush %v1521_v32 }
 0x18d   : > { %v2135_v41 = vpop.f32.mrb[0].mxu1 }
 0x18e   : > { %v358_v43 = vpop.f32.mrb[1].mxu1  ;;  %v1539_v37 = vpop.permute.xlu1 %1538 }
 0x18f   : > { %v2269_v48 = vpack.c.bf16 %v2135_v41, %v358_v43 }
 0x191   : > { %2270 = vmatprep.subr.bf16.mxu1 %v2269_v48 }
 0x192   : > { %v2152_v53 = vpop.f32.mrb[0].mxu0  ;;  %2272 = vmatpush3.bf16.msra.mxu1 %v2269_v48  ;;  %v1309_v48 = vmul.f32 %v1307_v39, %v2537_v18 }
 0x193   : > { %v580_v60 = vpop.f32.mrb[1].mxu0  ;;  %2282 = vmatprep.subr.bf16.mxu1 %v2506_v7 }
 0x194   : > { %v2277_v2 = vpack.c.bf16 %v2152_v53, %v580_v60  ;;  %v1317_v60 = vmul.f32 %v1314_v40, %v2543_v22 }
 0x195   : > { %2141 = vmatmul.mubr.msk.f32.vlgmr.msra.gmra.mrb[2].mxu1 %vm285_vm0, %v2619_v56 }
 0x196   : > { %2278 = vmatprep.subr.bf16.mxu0 %v2277_v2  ;;  %2143 = vmatprep.mubr.msk.f32.mxu1 %vm285_vm0, %v2626_v63  ;;  %v1319_v13 = vadd.f32 %v1317_v60, %v1310_v59 }
 0x197   : > { %2280 = vmatpush3.bf16.msra.mxu0 %v2277_v2  ;;  %2284 = vmatpush3.bf16.msra.mxu1 %v2506_v7  ;;  %v1318_v2 = vadd.f32 %v1316_v49, %v1309_v48 }
 0x198   : > { %2290 = vmatprep.subr.bf16.mxu0 %v2506_v7  ;;  %v1328_v17 = vadd.f32 %v1326_v11, %v1319_v13 }
 0x199   : > { %2144 = vmatmul.mubr.msk.f32.gmra.mrb[4].mxu1 %vm285_vm0, %v2638_v9  ;;  %v1327_v24 = vadd.f32 %v1325_v3, %v1318_v2 }
 0x19a   : > { %2158 = vmatmul.mubr.msk.f32.vlgmr.msra.gmra.mrb[2].mxu0 %vm285_vm0, %v2619_v56  ;;  %2167 = vmatprep.mubr.msk.f32.mxu1 %vm285_vm0, %v715_v6  ;;  %v1125_v6 = vmul.f32 %v1123_v54, %v2557_v38  ;;  %v1337_v36 = vadd.f32 %v1335_v31, %v1328_v17 }
 0x19b   : > { %2292 = vmatpush3.bf16.msra.mxu0 %v2506_v7  ;;  %2160 = vmatprep.mubr.msk.f32.mxu0 %vm285_vm0, %v2626_v63 }
 0x19c   : > { %v1127_v26 = vadd.f32 %v1125_v6, %v1118_v5  ;;  %v1343_v42 = vadd.f32 %v1340_v15, %v1337_v36 }
 0x19d   : > { %2168 = vmatmul.mubr.msk.f32.vlgmr.msra.gmra.mrb[6].mxu1 %vm285_vm0, %v716_v19  ;;  %v1126_v19 = vmul.f32 %v1123_v54, %v2553_v30 }
 0x19e   : > { %2161 = vmatmul.mubr.msk.f32.gmra.mrb[4].mxu0 %vm285_vm0, %v2638_v9  ;;  %2174 = vmatprep.mubr.msk.f32.mxu1 %vm285_vm0, %v2577_v14 }
 0x19f   : > { %2184 = vmatprep.mubr.msk.f32.mxu0 %vm285_vm0, %v924_v23  ;;  %v1128_v4 = vadd.f32 %v1126_v19, %v1119_v16 }
 0x1a1   : > { %v1134_v40 = vadd.f32 %v1131_v10, %v1128_v4 }
 0x1a2   : > { %2185 = vmatmul.mubr.msk.f32.vlgmr.msra.gmra.mrb[6].mxu0 %vm285_vm0, %v925_v25  ;;  %v1334_v25 = vmul.f32 %v1332_v8, %v2557_v38 }
 0x1a3   : > { %2191 = vmatprep.mubr.msk.f32.mxu0 %vm285_vm0, %v2577_v14 }
 0x1a4   : > { %v1336_v34 = vadd.f32 %v1334_v25, %v1327_v24 }
 0x1bc   : > { %s2380_s28 = spop %2379 }
 0x1bd   : > { %v1523_v45 = vstv %s2380_s28 }
 0x1be   : > { %v1525_v49 = vmul.f32 %v1523_v45, %v2541_v21 }
 0x268   : > { %v2142_v0 = vpop.f32.mrb[2].mxu1 }
 0x269   : > { %466 = vst.msk [vmem:[%s2683_s22 + $0x8] sm:$0xff] %vm464_vm1, %v2142_v0  ;;  %v445_v35 = vpop.f32.mrb[3].mxu1  ;;  %v1530_v0 = vpop.permute.xlu0 %1529 }
 0x26a   : > { %465 = vst.msk [vmem:[%s2683_s22] sm:$0xff] %vm464_vm1, %v445_v35  ;;  %v1133_v35 = vadd.f32 %v1131_v10, %v1127_v26 }
 0x26b   : > { %2381 = vpush %v1530_v0 }
 0x26c   : > { %v2145_v41 = vpop.f32.mrb[4].mxu1  ;;  %2383 = vpush %v1539_v37 }
 0x26d   : > { %v2159_v43 = vpop.f32.mrb[2].mxu0  ;;  %468 = vst.msk [vmem:[%s2683_s22 + $0x18] sm:$0xff] %vm464_vm1, %v2145_v41  ;;  %v455_v44 = vpop.f32.mrb[5].mxu1  ;;  %v1342_v41 = vadd.f32 %v1340_v15, %v1336_v34 }
 0x26e   : > { %675 = vst.msk [vmem:[%s2683_s22 + $0x28] sm:$0xff] %vm464_vm1, %v2159_v43  ;;  %v655_v47 = vpop.f32.mrb[3].mxu0  ;;  %467 = vst.msk [vmem:[%s2683_s22 + $0x10] sm:$0xff] %vm464_vm1, %v455_v44  ;;  %v1730_v39 = vpop.permute.xlu0 %1729 }
 0x26f   : > { %674 = vst.msk [vmem:[%s2683_s22 + $0x20] sm:$0xff] %vm464_vm1, %v655_v47  ;;  %v1739_v43 = vpop.permute.xlu1 %1738 }
 0x270   : > { %v2169_v53 = vpop.f32.mrb[6].mxu1  ;;  %2385 = vpush %v2664_v33  ;;  %v1516_v33 = vstv %s2378_s27 }
 0x271   : > { %v2162_v57 = vpop.f32.mrb[4].mxu0  ;;  %v789_v58 = vpop.f32.mrb[7].mxu1  ;;  %2387 = vpush %v1730_v39  ;;  %v1518_v48 = vmul.f32 %v1516_v33, %v2537_v18 }
 0x272   : > { %677 = vst.msk [vmem:[%s2683_s22 + $0x38] sm:$0xff] %vm464_vm1, %v2162_v57  ;;  %v665_v61 = vpop.f32.mrb[5].mxu0  ;;  %v2285_v62 = vpack.c.bf16 %v2169_v53, %v789_v58  ;;  %v1748_v44 = vpop.permute.xlu0 %1747  ;;  %v1519_v57 = vmul.f32 %v1516_v33, %v2539_v20 }
 0x273   : > { %676 = vst.msk [vmem:[%s2683_s22 + $0x30] sm:$0xff] %vm464_vm1, %v665_v61  ;;  %v1527_v58 = vadd.f32 %v1525_v49, %v1518_v48  ;;  %v1526_v61 = vmul.f32 %v1523_v45, %v2543_v22  ;;  %v1549_v0 = vpop.permute.xlu1 %1548 }
 0x274   : > { %2286 = vmatprep.subr.bf16.mxu1 %v2285_v62  ;;  %2389 = vpush %v1739_v43 }
 0x275   : > { %v2186_v12 = vpop.f32.mrb[6].mxu0  ;;  %2288 = vmatpush3.bf16.msra.mxu1 %v2285_v62  ;;  %2391 = vpush %v1748_v44  ;;  %v1528_v16 = vadd.f32 %v1526_v61, %v1519_v57 }
 0x276   : > { %v998_v23 = vpop.f32.mrb[7].mxu0  ;;  %2298 = vmatprep.subr.bf16.mxu1 %v2506_v7 }
 0x277   : > { %v2293_v27 = vpack.c.bf16 %v2186_v12, %v998_v23 }
 0x278   : > { %2175 = vmatmul.mubr.msk.f32.vlgmr.msra.gmra.mrb[8].mxu1 %vm285_vm0, %v2619_v56 }
 0x279   : > { %2294 = vmatprep.subr.bf16.mxu0 %v2293_v27  ;;  %2177 = vmatprep.mubr.msk.f32.mxu1 %vm285_vm0, %v2626_v63 }
 0x27a   : > { %2296 = vmatpush3.bf16.msra.mxu0 %v2293_v27  ;;  %2300 = vmatpush3.bf16.msra.mxu1 %v2506_v7 }
 0x27b   : > { %2306 = vmatprep.subr.bf16.mxu0 %v2506_v7 }
 0x27c   : > { %2178 = vmatmul.mubr.msk.f32.gmra.mrb[10].mxu1 %vm285_vm0, %v2638_v9 }
 0x27d   : > { %2192 = vmatmul.mubr.msk.f32.vlgmr.msra.gmra.mrb[8].mxu0 %vm285_vm0, %v2619_v56  ;;  %2201 = vmatprep.mubr.msk.f32.mxu1 %vm285_vm0, %v1133_v35 }
 0x27e   : > { %2308 = vmatpush3.bf16.msra.mxu0 %v2506_v7  ;;  %2194 = vmatprep.mubr.msk.f32.mxu0 %vm285_vm0, %v2626_v63 }
 0x280   : > { %2202 = vmatmul.mubr.msk.f32.vlgmr.msra.gmra.mrb[12].mxu1 %vm285_vm0, %v1134_v40 }
 0x281   : > { %2195 = vmatmul.mubr.msk.f32.gmra.mrb[10].mxu0 %vm285_vm0, %v2638_v9  ;;  %2208 = vmatprep.mubr.msk.f32.mxu1 %vm285_vm0, %v2577_v14 }
 0x282   : > { %2218 = vmatprep.mubr.msk.f32.mxu0 %vm285_vm0, %v1342_v41 }
 0x285   : > { %2219 = vmatmul.mubr.msk.f32.vlgmr.msra.gmra.mrb[12].mxu0 %vm285_vm0, %v1343_v42 }
 0x286   : > { %2225 = vmatprep.mubr.msk.f32.mxu0 %vm285_vm0, %v2577_v14 }
 0x29c   : > { %s2756_s29 = spop %2381 }
 0x29d   : > { %s2758_s30 = spop %2383  ;;  %v1532_v50 = vstv %s2756_s29 }
 0x29e   : > { %v1534_v59 = vmul.f32 %v1532_v50, %v2549_v28  ;;  %v1541_v62 = vstv %s2758_s30  ;;  %v1535_v6 = vmul.f32 %v1532_v50, %v2551_v29 }
 0x29f   : > { %v1543_v13 = vmul.f32 %v1541_v62, %v2557_v38  ;;  %v1544_v31 = vmul.f32 %v1541_v62, %v2553_v30 }
 0x2a0   : > { %v1536_v12 = vadd.f32 %v1534_v59, %v1527_v58  ;;  %v1537_v17 = vadd.f32 %v1535_v6, %v1528_v16 }
 0x2a1   : > { %s2760_s6 = spop %2385 }
 0x2a2   : > { %s2762_s7 = spop %2387  ;;  %v1725_v51 = vstv %s2760_s6  ;;  %v1546_v36 = vadd.f32 %v1544_v31, %v1537_v17 }
 0x2a3   : > { %v1732_v52 = vstv %s2762_s7  ;;  %v1727_v1 = vmul.f32 %v1725_v51, %v2537_v18  ;;  %v1728_v11 = vmul.f32 %v1725_v51, %v2539_v20  ;;  %v1545_v20 = vadd.f32 %v1543_v13, %v1536_v12 }
 0x2a4   : > { %v1734_v2 = vmul.f32 %v1732_v52, %v2541_v21  ;;  %v1735_v18 = vmul.f32 %v1732_v52, %v2543_v22 }
 0x2a5   : > { %s2773_s8 = spop %2389  ;;  %v1551_v35 = vadd.f32 %v1549_v0, %v1545_v20 }
 0x2a6   : > { %v1741_v3 = vstv %s2773_s8  ;;  %s2791_s9 = spop %2391  ;;  %v1736_v19 = vadd.f32 %v1734_v2, %v1727_v1  ;;  %v1737_v26 = vadd.f32 %v1735_v18, %v1728_v11 }
 0x2a7   : > { %v1743_v23 = vmul.f32 %v1741_v3, %v2549_v28  ;;  %v1750_v24 = vstv %s2791_s9  ;;  %v1744_v27 = vmul.f32 %v1741_v3, %v2551_v29 }
 0x2a8   : > { %v1752_v4 = vmul.f32 %v1750_v24, %v2557_v38  ;;  %v1753_v29 = vmul.f32 %v1750_v24, %v2553_v30  ;;  %v1758_v38 = vpop.permute.xlu0 %1757  ;;  %v1552_v30 = vadd.f32 %v1549_v0, %v1546_v36 }
 0x2a9   : > { %v1745_v32 = vadd.f32 %v1743_v23, %v1736_v19  ;;  %v1746_v34 = vadd.f32 %v1744_v27, %v1737_v26 }
 0x2ab   : > { %v1754_v37 = vadd.f32 %v1752_v4, %v1745_v32  ;;  %v1755_v39 = vadd.f32 %v1753_v29, %v1746_v34 }
 0x2ad   : > { %v1760_v40 = vadd.f32 %v1758_v38, %v1754_v37  ;;  %v1761_v41 = vadd.f32 %v1758_v38, %v1755_v39 }
 0x34b   : > { %v2176_v46 = vpop.f32.mrb[8].mxu1 }
 0x34c   : > { %884 = vst.msk [vmem:[%s2683_s22 + $0x48] sm:$0xff] %vm464_vm1, %v2176_v46  ;;  %v864_v47 = vpop.f32.mrb[9].mxu1 }
 0x34d   : > { %883 = vst.msk [vmem:[%s2683_s22 + $0x40] sm:$0xff] %vm464_vm1, %v864_v47 }
 0x34f   : > { %v2179_v53 = vpop.f32.mrb[10].mxu1 }
 0x350   : > { %v2193_v54 = vpop.f32.mrb[8].mxu0  ;;  %886 = vst.msk [vmem:[%s2683_s22 + $0x58] sm:$0xff] %vm464_vm1, %v2179_v53  ;;  %v874_v55 = vpop.f32.mrb[11].mxu1 }
 0x351   : > { %1093 = vst.msk [vmem:[%s2683_s22 + $0x68] sm:$0xff] %vm464_vm1, %v2193_v54  ;;  %v1073_v60 = vpop.f32.mrb[9].mxu0  ;;  %885 = vst.msk [vmem:[%s2683_s22 + $0x50] sm:$0xff] %vm464_vm1, %v874_v55 }
 0x352   : > { %1092 = vst.msk [vmem:[%s2683_s22 + $0x60] sm:$0xff] %vm464_vm1, %v1073_v60 }
 0x353   : > { %v2203_v5 = vpop.f32.mrb[12].mxu1 }
 0x354   : > { %v2196_v8 = vpop.f32.mrb[10].mxu0  ;;  %v1207_v10 = vpop.f32.mrb[13].mxu1 }
 0x355   : > { %1095 = vst.msk [vmem:[%s2683_s22 + $0x78] sm:$0xff] %vm464_vm1, %v2196_v8  ;;  %v1083_v21 = vpop.f32.mrb[11].mxu0  ;;  %v2301_v15 = vpack.c.bf16 %v2203_v5, %v1207_v10 }
 0x356   : > { %1094 = vst.msk [vmem:[%s2683_s22 + $0x70] sm:$0xff] %vm464_vm1, %v1083_v21 }
 0x357   : > { %2302 = vmatprep.subr.bf16.mxu1 %v2301_v15 }
 0x358   : > { %v2220_v25 = vpop.f32.mrb[12].mxu0  ;;  %2304 = vmatpush3.bf16.msra.mxu1 %v2301_v15 }
 0x359   : > { %v1416_v22 = vpop.f32.mrb[13].mxu0  ;;  %2314 = vmatprep.subr.bf16.mxu1 %v2506_v7 }
 0x35a   : > { %v2309_v28 = vpack.c.bf16 %v2220_v25, %v1416_v22 }
 0x35b   : > { %2209 = vmatmul.mubr.msk.f32.vlgmr.msra.gmra.mrb[14].mxu1 %vm285_vm0, %v2619_v56 }
 0x35c   : > { %2310 = vmatprep.subr.bf16.mxu0 %v2309_v28  ;;  %2211 = vmatprep.mubr.msk.f32.mxu1 %vm285_vm0, %v2626_v63 }
 0x35d   : > { %2312 = vmatpush3.bf16.msra.mxu0 %v2309_v28  ;;  %2316 = vmatpush3.bf16.msra.mxu1 %v2506_v7 }
 0x35e   : > { %2322 = vmatprep.subr.bf16.mxu0 %v2506_v7 }
 0x35f   : > { %2212 = vmatmul.mubr.msk.f32.gmra.mrb[16].mxu1 %vm285_vm0, %v2638_v9 }
 0x360   : > { %2226 = vmatmul.mubr.msk.f32.vlgmr.msra.gmra.mrb[14].mxu0 %vm285_vm0, %v2619_v56  ;;  %2235 = vmatprep.mubr.msk.f32.mxu1 %vm285_vm0, %v1551_v35 }
 0x361   : > { %2324 = vmatpush3.bf16.msra.mxu0 %v2506_v7  ;;  %2228 = vmatprep.mubr.msk.f32.mxu0 %vm285_vm0, %v2626_v63 }
 0x363   : > { %2236 = vmatmul.mubr.msk.f32.vlgmr.msra.gmra.mrb[18].mxu1 %vm285_vm0, %v1552_v30 }
 0x364   : > { %2229 = vmatmul.mubr.msk.f32.gmra.mrb[16].mxu0 %vm285_vm0, %v2638_v9  ;;  %2242 = vmatprep.mubr.msk.f32.mxu1 %vm285_vm0, %v2577_v14 }
 0x365   : > { %2252 = vmatprep.mubr.msk.f32.mxu0 %vm285_vm0, %v1760_v40 }
 0x368   : > { %2253 = vmatmul.mubr.msk.f32.vlgmr.msra.gmra.mrb[18].mxu0 %vm285_vm0, %v1761_v41 }
 0x369   : > { %2259 = vmatprep.mubr.msk.f32.mxu0 %vm285_vm0, %v2577_v14 }
 0x42e   : > { %v2210_v7 = vpop.f32.mrb[14].mxu1 }
 0x42f   : > { %1302 = vst.msk [vmem:[%s2683_s22 + $0x88] sm:$0xff] %vm464_vm1, %v2210_v7  ;;  %v1282_v42 = vpop.f32.mrb[15].mxu1 }
 0x430   : > { %1301 = vst.msk [vmem:[%s2683_s22 + $0x80] sm:$0xff] %vm464_vm1, %v1282_v42 }
 0x432   : > { %v2213_v43 = vpop.f32.mrb[16].mxu1 }
 0x433   : > { %v2227_v44 = vpop.f32.mrb[14].mxu0  ;;  %1304 = vst.msk [vmem:[%s2683_s22 + $0x98] sm:$0xff] %vm464_vm1, %v2213_v43  ;;  %v1292_v33 = vpop.f32.mrb[17].mxu1 }
 0x434   : > { %1511 = vst.msk [vmem:[%s2683_s22 + $0xa8] sm:$0xff] %vm464_vm1, %v2227_v44  ;;  %v1491_v45 = vpop.f32.mrb[15].mxu0  ;;  %1303 = vst.msk [vmem:[%s2683_s22 + $0x90] sm:$0xff] %vm464_vm1, %v1292_v33 }
 0x435   : > { %1510 = vst.msk [vmem:[%s2683_s22 + $0xa0] sm:$0xff] %vm464_vm1, %v1491_v45 }
 0x436   : > { %v2237_v14 = vpop.f32.mrb[18].mxu1 }
 0x437   : > { %v2230_v46 = vpop.f32.mrb[16].mxu0  ;;  %v1625_v47 = vpop.f32.mrb[19].mxu1 }
 0x438   : > { %1513 = vst.msk [vmem:[%s2683_s22 + $0xb8] sm:$0xff] %vm464_vm1, %v2230_v46  ;;  %v1501_v48 = vpop.f32.mrb[17].mxu0  ;;  %v2317_v49 = vpack.c.bf16 %v2237_v14, %v1625_v47 }
 0x439   : > { %1512 = vst.msk [vmem:[%s2683_s22 + $0xb0] sm:$0xff] %vm464_vm1, %v1501_v48 }
 0x43a   : > { %2318 = vmatprep.subr.bf16.mxu1 %v2317_v49 }
 0x43b   : > { %v2254_v50 = vpop.f32.mrb[18].mxu0  ;;  %2320 = vmatpush3.bf16.msra.mxu1 %v2317_v49 }
 0x43c   : > { %v1834_v51 = vpop.f32.mrb[19].mxu0 }
 0x43d   : > { %v2325_v52 = vpack.c.bf16 %v2254_v50, %v1834_v51 }
 0x43e   : > { %2243 = vmatmul.mubr.msk.f32.vlgmr.msra.gmra.mrb[20].mxu1 %vm285_vm0, %v2619_v56 }
 0x43f   : > { %2326 = vmatprep.subr.bf16.mxu0 %v2325_v52  ;;  %2245 = vmatprep.mubr.msk.f32.mxu1 %vm285_vm0, %v2626_v63 }
 0x440   : > { %2328 = vmatpush3.bf16.msra.mxu0 %v2325_v52 }
 0x442   : > { %2246 = vmatmul.mubr.msk.f32.gmra.mrb[22].mxu1 %vm285_vm0, %v2638_v9 }
 0x443   : > { %2260 = vmatmul.mubr.msk.f32.vlgmr.msra.gmra.mrb[20].mxu0 %vm285_vm0, %v2619_v56 }
 0x444   : > { %2262 = vmatprep.mubr.msk.f32.mxu0 %vm285_vm0, %v2626_v63 }
 0x447   : > { %2263 = vmatmul.mubr.msk.f32.gmra.mrb[22].mxu0 %vm285_vm0, %v2638_v9 }
 0x511   : > { %v2244_v53 = vpop.f32.mrb[20].mxu1 }
 0x512   : > { %1720 = vst.msk [vmem:[%s2683_s22 + $0xc8] sm:$0xff] %vm464_vm1, %v2244_v53  ;;  %v1700_v54 = vpop.f32.mrb[21].mxu1 }
 0x513   : > { %1719 = vst.msk [vmem:[%s2683_s22 + $0xc0] sm:$0xff] %vm464_vm1, %v1700_v54 }
 0x515   : > { %v2247_v55 = vpop.f32.mrb[22].mxu1 }
 0x516   : > { %v2261_v57 = vpop.f32.mrb[20].mxu0  ;;  %1722 = vst.msk [vmem:[%s2683_s22 + $0xd8] sm:$0xff] %vm464_vm1, %v2247_v55  ;;  %v1710_v58 = vpop.f32.mrb[23].mxu1 }
 0x517   : > { %1929 = vst.msk [vmem:[%s2683_s22 + $0xe8] sm:$0xff] %vm464_vm1, %v2261_v57  ;;  %v1909_v56 = vpop.f32.mrb[21].mxu0  ;;  %1721 = vst.msk [vmem:[%s2683_s22 + $0xd0] sm:$0xff] %vm464_vm1, %v1710_v58 }
 0x518   : > { %1928 = vst.msk [vmem:[%s2683_s22 + $0xe0] sm:$0xff] %vm464_vm1, %v1909_v56 }
 0x51a   : > { %v2264_v63 = vpop.f32.mrb[22].mxu0 }
 0x51b   : > { %1931 = vst.msk [vmem:[%s2683_s22 + $0xf8] sm:$0xff] %vm464_vm1, %v2264_v63  ;;  %v1919_v9 = vpop.f32.mrb[23].mxu0 }
 0x51c   : > { %1930 = vst.msk [vmem:[%s2683_s22 + $0xf0] sm:$0xff] %vm464_vm1, %v1919_v9 }
 0x51d PF: > { %s15_s18 = sadd.s32 1, %s2426_s18  }
 0x51e   : > { %p12_p4 = scmp.ge.s32.totalorder %s15_s18, 4  }
 0x520   :  { %14 = sbr.rel (!%p12_p4) target bundleno = 1 (0x1), region = 70 }

</bundles_post_ra>
